<compile_context>
chip_gen: v7x
topology: tpu7x:2x2x1
jax: 0.10.0
libtpu: 0.0.40
codegen_flags: <defaults>
</compile_context>

<pallas_src>
import functools

import jax
import jax.numpy as jnp
from jax.experimental import pallas as pl
from jax.experimental.pallas import tpu as pltpu


def _mlp_kernel(*refs, num_layers, relu_first, eps, n_real, n_pad):
    # refs = (x, W_0..W_{L-1}, b_0..b_{L-1}, gamma_0..gamma_{L-1},
    #         beta_0..beta_{L-1}, out)
    x_ref = refs[0]
    w_refs = refs[1:1 + num_layers]
    b_refs = refs[1 + num_layers:1 + 2 * num_layers]
    g_refs = refs[1 + 2 * num_layers:1 + 3 * num_layers]
    be_refs = refs[1 + 3 * num_layers:1 + 4 * num_layers]
    out_ref = refs[1 + 4 * num_layers]

    inv_n = jnp.float32(1.0 / n_real)
    if n_pad != n_real:
        # Padded batch rows carry the linear bias; exclude them from BN stats.
        row_ids = jax.lax.broadcasted_iota(jnp.int32, (n_pad, 1), 0)
        row_mask = row_ids < n_real
    else:
        row_mask = None  # batch % 16 == 0: no per-element masking at all

    def linear(h_bf16, i):
        # bf16 MXU operands (weights pre-cast at init), f32 accumulate.
        return (jnp.dot(h_bf16, w_refs[i][...],
                        preferred_element_type=jnp.float32)
                + b_refs[i][...])

    def batchnorm(h, i):
        # Training-mode BatchNorm1d (batch mean, biased batch variance), folded:
        # one pass for sum/sumsq, one FMA for the normalization.
        # TODO(synk): for large N switch to a centered two-pass scheme
        # (E[h^2]-mean^2 cancels when |mean| >> std).
        hm = h if row_mask is None else jnp.where(row_mask, h, 0.0)
        s1 = jnp.sum(hm, axis=0, keepdims=True)
        s2 = jnp.sum(hm * hm, axis=0, keepdims=True)
        mean = s1 * inv_n
        var = jnp.maximum(s2 * inv_n - mean * mean, 0.0)
        scale = g_refs[i][...] * jax.lax.rsqrt(var + eps)   # rsqrt -> EUP (free slot)
        shift = be_refs[i][...] - mean * scale
        return h * scale + shift

    h = linear(x_ref[...], 0)                 # x already bf16 -> no cast needed
    for i in range(1, num_layers):
        if relu_first:
            h = jnp.maximum(h, 0.0)
        h = batchnorm(h, i - 1)
        if not relu_first:
            h = jnp.maximum(h, 0.0)
        # TODO(synk): dropout with p>0 in training mode would need pltpu.prng_seed /
        # prng_random_bits bernoulli masking; module default p=0.0 => identity.
        # TODO(synk): for relu_first=True, BN scale/shift could be folded into
        # w_refs[i]/b_refs[i] at init (BN directly precedes the matmul there),
        # removing ~2 VPU ops/element/layer from the binding slot.
        h = linear(h.astype(jnp.bfloat16), i)
    h = batchnorm(h, num_layers - 1)
    out_ref[...] = h.astype(out_ref.dtype)


def _pad_up(n, m):
    return ((n + m - 1) // m) * m


def make_mlp_forward(weights, biases, gammas, betas, *, relu_first=False, eps=1e-5,
                     lane_multiple=128, sublane_multiple=16):
    """Pads/casts all parameters ONCE and returns a jitted forward(x) closure.

    weights[i]: (C_i, C_{i+1}); biases/gammas/betas[i]: (1, C_{i+1}) or (C_{i+1},).
    Zero gamma/beta/weight padding keeps padded columns exactly zero through every
    layer, so results are unchanged after slicing back to the true shape.
    """
    num_layers = len(weights)
    chans = [weights[0].shape[0]] + [w.shape[1] for w in weights]
    c_pad = [_pad_up(c, lane_multiple) for c in chans]

    def pad_vec(v, co_pad, c_out):
        return (jnp.zeros((1, co_pad), jnp.float32)
                .at[:, :c_out].set(jnp.reshape(jnp.asarray(v, jnp.float32), (1, -1))))

    wp, bp, gp, bep = [], [], [], []
    for i, (w, b, g, be) in enumerate(zip(weights, biases, gammas, betas)):
        ci, co = c_pad[i], c_pad[i + 1]
        c_out = w.shape[1]
        wp.append(jnp.zeros((ci, co), jnp.float32)
                  .at[:w.shape[0], :c_out].set(jnp.asarray(w, jnp.float32))
                  .astype(jnp.bfloat16))
        bp.append(pad_vec(b, co, c_out))
        gp.append(pad_vec(g, co, c_out))
        bep.append(pad_vec(be, co, c_out))
    # Materialize now so none of this prep ever lands on the forward call path.
    wp, bp, gp, bep = jax.block_until_ready(
        (tuple(wp), tuple(bp), tuple(gp), tuple(bep)))

    # Generation-aware physical VMEM (64 MiB/TC on v7x, 128 MiB on v5e/v6e).
    try:
        phys_vmem = int(getattr(pltpu.get_tpu_info(), "vmem_capacity_bytes",
                                128 * 1024 * 1024))
    except Exception:  # pragma: no cover - conservative fallback
        phys_vmem = 128 * 1024 * 1024

    param_bytes = (sum(ci * co * 2 for ci, co in zip(c_pad[:-1], c_pad[1:]))
                   + 3 * 4 * sum(c_pad[1:]))

    def forward(x):
        n = x.shape[0]
        n_pad = _pad_up(n, sublane_multiple)
        # Only per-call prep: one bf16 pad of x (half the HBM bytes of f32).
        xp = (jnp.zeros((n_pad, c_pad[0]), jnp.bfloat16)
              .at[:n, :chans[0]].set(x.astype(jnp.bfloat16)))

        # Resident-bytes estimate (input + output + params + f32 working
        # activations), doubled for compiler scratch headroom, capped below the
        # physical VMEM of this generation.
        act_bytes = 3 * n_pad * max(c_pad) * 4
        resident = (n_pad * c_pad[0] * 2 + n_pad * c_pad[-1] * 4
                    + param_bytes + act_bytes)
        vmem_limit = max(2 * resident, 16 * 1024 * 1024)
        vmem_limit = min(vmem_limit, int(phys_vmem * 0.85))

        kernel = functools.partial(_mlp_kernel, num_layers=num_layers,
                                   relu_first=relu_first, eps=eps,
                                   n_real=n, n_pad=n_pad)
        args = (xp, *wp, *bp, *gp, *bep)
        in_specs = [pl.BlockSpec(memory_space=pltpu.MemorySpace.VMEM) for _ in args]
        out_padded = pl.pallas_call(
            kernel,
            out_shape=jax.ShapeDtypeStruct((n_pad, c_pad[-1]), jnp.float32),
            in_specs=in_specs,
            out_specs=pl.BlockSpec(memory_space=pltpu.MemorySpace.VMEM),
            compiler_params=pltpu.CompilerParams(vmem_limit_bytes=vmem_limit),
        )(*args)
        return out_padded[:n, :chans[-1]]

    return jax.jit(forward)


def _reference_mlp(x, weights, biases, gammas, betas, relu_first=False, eps=1e-5,
                   bf16_matmul=True):
    """Pure-JAX reference. bf16_matmul=True mirrors the kernel's MXU dtype choice;
    bf16_matmul=False is the exact f32 torch-module semantics."""
    def dot(h, w):
        if bf16_matmul:
            return jnp.dot(h.astype(jnp.bfloat16), w.astype(jnp.bfloat16),
                           preferred_element_type=jnp.float32)
        return jnp.dot(h, w)

    def bn(h, g, b):
        m = h.mean(0, keepdims=True)
        v = jnp.square(h - m).mean(0, keepdims=True)
        return (h - m) / jnp.sqrt(v + eps) * g.reshape(1, -1) + b.reshape(1, -1)

    h = dot(x.astype(jnp.float32), weights[0]) + biases[0].reshape(1, -1)
    for i in range(1, len(weights)):
        if relu_first:
            h = jnp.maximum(h, 0.0)
        h = bn(h, gammas[i - 1], betas[i - 1])
        if not relu_first:
            h = jnp.maximum(h, 0.0)
        h = dot(h, weights[i]) + biases[i].reshape(1, -1)
    return bn(h, gammas[-1], betas[-1])


if __name__ == "__main__":
    channel_list = [32, 64, 48, 32]   # MLP([32, 64, 48, 32])
    N = 16

    key = jax.random.PRNGKey(0)
    key, kx = jax.random.split(key)
    x = jax.random.normal(kx, (N, channel_list[0]), dtype=jnp.float32)

    weights, biases, gammas, betas = [], [], [], []
    for c_in, c_out in zip(channel_list[:-1], channel_list[1:]):
        key, kw, kb, kg, kbe = jax.random.split(key, 5)
        bound = 1.0 / (c_in ** 0.5)
        weights.append(jax.random.uniform(kw, (c_in, c_out), jnp.float32,
                                          minval=-bound, maxval=bound))
        biases.append(jax.random.uniform(kb, (1, c_out), jnp.float32,
                                         minval=-bound, maxval=bound))
        gammas.append(1.0 + 0.1 * jax.random.normal(kg, (1, c_out), jnp.float32))
        betas.append(0.1 * jax.random.normal(kbe, (1, c_out), jnp.float32))

    # Parameter padding / bf16 casting happens exactly once, here at init.
    mlp_fwd = make_mlp_forward(weights, biases, gammas, betas, relu_first=False)

    out = jax.block_until_ready(mlp_fwd(x))
    assert out.shape == (N, channel_list[-1])

    # Tight check against a reference that mirrors the kernel's bf16-MXU / f32-BN math.
    ref_bf16 = _reference_mlp(x, weights, biases, gammas, betas,
                              relu_first=False, bf16_matmul=True)
    assert jnp.allclose(out, ref_bf16, atol=1e-3, rtol=1e-3), "mismatch vs bf16 reference"

    # Loose check against the exact f32 torch-module semantics (bf16 rounding only).
    ref_f32 = _reference_mlp(x, weights, biases, gammas, betas,
                             relu_first=False, bf16_matmul=False)
    assert jnp.allclose(out, ref_f32, atol=1e-1, rtol=1e-1), "mismatch vs f32 reference"

    print("KERNEL_OK")
</pallas_src>

<mosaic_0001>
module attributes {stable_mosaic.version = 11 : i64} {
  func.func @_mlp_kernel(%arg0: memref<16x128xbf16, #tpu.memory_space<vmem>>, %arg1: memref<128x128xbf16, #tpu.memory_space<vmem>>, %arg2: memref<128x128xbf16, #tpu.memory_space<vmem>>, %arg3: memref<128x128xbf16, #tpu.memory_space<vmem>>, %arg4: memref<1x128xf32, #tpu.memory_space<vmem>>, %arg5: memref<1x128xf32, #tpu.memory_space<vmem>>, %arg6: memref<1x128xf32, #tpu.memory_space<vmem>>, %arg7: memref<1x128xf32, #tpu.memory_space<vmem>>, %arg8: memref<1x128xf32, #tpu.memory_space<vmem>>, %arg9: memref<1x128xf32, #tpu.memory_space<vmem>>, %arg10: memref<1x128xf32, #tpu.memory_space<vmem>>, %arg11: memref<1x128xf32, #tpu.memory_space<vmem>>, %arg12: memref<1x128xf32, #tpu.memory_space<vmem>>, %arg13: memref<16x128xf32, #tpu.memory_space<vmem>>) attributes {dimension_semantics = [], scalar_prefetch = 0 : i64, scratch_operands = 0 : i64, tpu.core_type = #tpu.core_type<tc>} {
    %c0 = arith.constant 0 : index
    %c0_0 = arith.constant 0 : index
    %0 = vector.load %arg0[%c0, %c0_0] : memref<16x128xbf16, #tpu.memory_space<vmem>>, vector<16x128xbf16>
    %c0_1 = arith.constant 0 : index
    %c0_2 = arith.constant 0 : index
    %1 = vector.load %arg1[%c0_1, %c0_2] : memref<128x128xbf16, #tpu.memory_space<vmem>>, vector<128x128xbf16>
    %cst = arith.constant dense<0.000000e+00> : vector<16x128xf32>
    %2 = tpu.matmul %0, %1, %cst {dimension_numbers = #tpu.dot_dimension_numbers<[1], [0], [0], [1], [0, 0, 1, 1], [], []>} : vector<16x128xbf16>, vector<128x128xbf16>, vector<16x128xf32> -> vector<16x128xf32>
    %c0_3 = arith.constant 0 : index
    %c0_4 = arith.constant 0 : index
    %3 = vector.load %arg4[%c0_3, %c0_4] : memref<1x128xf32, #tpu.memory_space<vmem>>, vector<1x128xf32>
    %4 = vector.broadcast %3 : vector<1x128xf32> to vector<16x128xf32>
    %5 = arith.addf %2, %4 : vector<16x128xf32>
    %cst_5 = arith.constant dense<0.000000e+00> : vector<128xf32>
    %6 = vector.multi_reduction <add>, %5, %cst_5 [0] : vector<16x128xf32> to vector<128xf32>
    %7 = vector.shape_cast %6 : vector<128xf32> to vector<1x128xf32>
    %8 = arith.mulf %5, %5 : vector<16x128xf32>
    %cst_6 = arith.constant dense<0.000000e+00> : vector<128xf32>
    %9 = vector.multi_reduction <add>, %8, %cst_6 [0] : vector<16x128xf32> to vector<128xf32>
    %10 = vector.shape_cast %9 : vector<128xf32> to vector<1x128xf32>
    %cst_7 = arith.constant 6.250000e-02 : f32
    %11 = vector.broadcast %cst_7 : f32 to vector<1x128xf32>
    %12 = arith.mulf %7, %11 : vector<1x128xf32>
    %cst_8 = arith.constant 6.250000e-02 : f32
    %13 = vector.broadcast %cst_8 : f32 to vector<1x128xf32>
    %14 = arith.mulf %10, %13 : vector<1x128xf32>
    %15 = arith.mulf %12, %12 : vector<1x128xf32>
    %16 = arith.subf %14, %15 : vector<1x128xf32>
    %cst_9 = arith.constant 0.000000e+00 : f32
    %17 = vector.broadcast %cst_9 : f32 to vector<1x128xf32>
    %18 = arith.maximumf %16, %17 : vector<1x128xf32>
    %c0_10 = arith.constant 0 : index
    %c0_11 = arith.constant 0 : index
    %19 = vector.load %arg7[%c0_10, %c0_11] : memref<1x128xf32, #tpu.memory_space<vmem>>, vector<1x128xf32>
    %cst_12 = arith.constant 9.99999974E-6 : f32
    %20 = vector.broadcast %cst_12 : f32 to vector<1x128xf32>
    %21 = arith.addf %18, %20 : vector<1x128xf32>
    %22 = math.rsqrt %21 : vector<1x128xf32>
    %23 = arith.mulf %19, %22 : vector<1x128xf32>
    %c0_13 = arith.constant 0 : index
    %c0_14 = arith.constant 0 : index
    %24 = vector.load %arg10[%c0_13, %c0_14] : memref<1x128xf32, #tpu.memory_space<vmem>>, vector<1x128xf32>
    %25 = arith.mulf %12, %23 : vector<1x128xf32>
    %26 = arith.subf %24, %25 : vector<1x128xf32>
    %27 = vector.broadcast %23 : vector<1x128xf32> to vector<16x128xf32>
    %28 = arith.mulf %5, %27 : vector<16x128xf32>
    %29 = vector.broadcast %26 : vector<1x128xf32> to vector<16x128xf32>
    %30 = arith.addf %28, %29 : vector<16x128xf32>
    %cst_15 = arith.constant 0.000000e+00 : f32
    %31 = vector.broadcast %cst_15 : f32 to vector<16x128xf32>
    %32 = arith.maximumf %30, %31 : vector<16x128xf32>
    %33 = arith.truncf %32 : vector<16x128xf32> to vector<16x128xbf16>
    %c0_16 = arith.constant 0 : index
    %c0_17 = arith.constant 0 : index
    %34 = vector.load %arg2[%c0_16, %c0_17] : memref<128x128xbf16, #tpu.memory_space<vmem>>, vector<128x128xbf16>
    %cst_18 = arith.constant dense<0.000000e+00> : vector<16x128xf32>
    %35 = tpu.matmul %33, %34, %cst_18 {dimension_numbers = #tpu.dot_dimension_numbers<[1], [0], [0], [1], [0, 0, 1, 1], [], []>} : vector<16x128xbf16>, vector<128x128xbf16>, vector<16x128xf32> -> vector<16x128xf32>
    %c0_19 = arith.constant 0 : index
    %c0_20 = arith.constant 0 : index
    %36 = vector.load %arg5[%c0_19, %c0_20] : memref<1x128xf32, #tpu.memory_space<vmem>>, vector<1x128xf32>
    %37 = vector.broadcast %36 : vector<1x128xf32> to vector<16x128xf32>
    %38 = arith.addf %35, %37 : vector<16x128xf32>
    %cst_21 = arith.constant dense<0.000000e+00> : vector<128xf32>
    %39 = vector.multi_reduction <add>, %38, %cst_21 [0] : vector<16x128xf32> to vector<128xf32>
    %40 = vector.shape_cast %39 : vector<128xf32> to vector<1x128xf32>
    %41 = arith.mulf %38, %38 : vector<16x128xf32>
    %cst_22 = arith.constant dense<0.000000e+00> : vector<128xf32>
    %42 = vector.multi_reduction <add>, %41, %cst_22 [0] : vector<16x128xf32> to vector<128xf32>
    %43 = vector.shape_cast %42 : vector<128xf32> to vector<1x128xf32>
    %cst_23 = arith.constant 6.250000e-02 : f32
    %44 = vector.broadcast %cst_23 : f32 to vector<1x128xf32>
    %45 = arith.mulf %40, %44 : vector<1x128xf32>
    %cst_24 = arith.constant 6.250000e-02 : f32
    %46 = vector.broadcast %cst_24 : f32 to vector<1x128xf32>
    %47 = arith.mulf %43, %46 : vector<1x128xf32>
    %48 = arith.mulf %45, %45 : vector<1x128xf32>
    %49 = arith.subf %47, %48 : vector<1x128xf32>
    %cst_25 = arith.constant 0.000000e+00 : f32
    %50 = vector.broadcast %cst_25 : f32 to vector<1x128xf32>
    %51 = arith.maximumf %49, %50 : vector<1x128xf32>
    %c0_26 = arith.constant 0 : index
    %c0_27 = arith.constant 0 : index
    %52 = vector.load %arg8[%c0_26, %c0_27] : memref<1x128xf32, #tpu.memory_space<vmem>>, vector<1x128xf32>
    %cst_28 = arith.constant 9.99999974E-6 : f32
    %53 = vector.broadcast %cst_28 : f32 to vector<1x128xf32>
    %54 = arith.addf %51, %53 : vector<1x128xf32>
    %55 = math.rsqrt %54 : vector<1x128xf32>
    %56 = arith.mulf %52, %55 : vector<1x128xf32>
    %c0_29 = arith.constant 0 : index
    %c0_30 = arith.constant 0 : index
    %57 = vector.load %arg11[%c0_29, %c0_30] : memref<1x128xf32, #tpu.memory_space<vmem>>, vector<1x128xf32>
    %58 = arith.mulf %45, %56 : vector<1x128xf32>
    %59 = arith.subf %57, %58 : vector<1x128xf32>
    %60 = vector.broadcast %56 : vector<1x128xf32> to vector<16x128xf32>
    %61 = arith.mulf %38, %60 : vector<16x128xf32>
    %62 = vector.broadcast %59 : vector<1x128xf32> to vector<16x128xf32>
    %63 = arith.addf %61, %62 : vector<16x128xf32>
    %cst_31 = arith.constant 0.000000e+00 : f32
    %64 = vector.broadcast %cst_31 : f32 to vector<16x128xf32>
    %65 = arith.maximumf %63, %64 : vector<16x128xf32>
    %66 = arith.truncf %65 : vector<16x128xf32> to vector<16x128xbf16>
    %c0_32 = arith.constant 0 : index
    %c0_33 = arith.constant 0 : index
    %67 = vector.load %arg3[%c0_32, %c0_33] : memref<128x128xbf16, #tpu.memory_space<vmem>>, vector<128x128xbf16>
    %cst_34 = arith.constant dense<0.000000e+00> : vector<16x128xf32>
    %68 = tpu.matmul %66, %67, %cst_34 {dimension_numbers = #tpu.dot_dimension_numbers<[1], [0], [0], [1], [0, 0, 1, 1], [], []>} : vector<16x128xbf16>, vector<128x128xbf16>, vector<16x128xf32> -> vector<16x128xf32>
    %c0_35 = arith.constant 0 : index
    %c0_36 = arith.constant 0 : index
    %69 = vector.load %arg6[%c0_35, %c0_36] : memref<1x128xf32, #tpu.memory_space<vmem>>, vector<1x128xf32>
    %70 = vector.broadcast %69 : vector<1x128xf32> to vector<16x128xf32>
    %71 = arith.addf %68, %70 : vector<16x128xf32>
    %cst_37 = arith.constant dense<0.000000e+00> : vector<128xf32>
    %72 = vector.multi_reduction <add>, %71, %cst_37 [0] : vector<16x128xf32> to vector<128xf32>
    %73 = vector.shape_cast %72 : vector<128xf32> to vector<1x128xf32>
    %74 = arith.mulf %71, %71 : vector<16x128xf32>
    %cst_38 = arith.constant dense<0.000000e+00> : vector<128xf32>
    %75 = vector.multi_reduction <add>, %74, %cst_38 [0] : vector<16x128xf32> to vector<128xf32>
    %76 = vector.shape_cast %75 : vector<128xf32> to vector<1x128xf32>
    %cst_39 = arith.constant 6.250000e-02 : f32
    %77 = vector.broadcast %cst_39 : f32 to vector<1x128xf32>
    %78 = arith.mulf %73, %77 : vector<1x128xf32>
    %cst_40 = arith.constant 6.250000e-02 : f32
    %79 = vector.broadcast %cst_40 : f32 to vector<1x128xf32>
    %80 = arith.mulf %76, %79 : vector<1x128xf32>
    %81 = arith.mulf %78, %78 : vector<1x128xf32>
    %82 = arith.subf %80, %81 : vector<1x128xf32>
    %cst_41 = arith.constant 0.000000e+00 : f32
    %83 = vector.broadcast %cst_41 : f32 to vector<1x128xf32>
    %84 = arith.maximumf %82, %83 : vector<1x128xf32>
    %c0_42 = arith.constant 0 : index
    %c0_43 = arith.constant 0 : index
    %85 = vector.load %arg9[%c0_42, %c0_43] : memref<1x128xf32, #tpu.memory_space<vmem>>, vector<1x128xf32>
    %cst_44 = arith.constant 9.99999974E-6 : f32
    %86 = vector.broadcast %cst_44 : f32 to vector<1x128xf32>
    %87 = arith.addf %84, %86 : vector<1x128xf32>
    %88 = math.rsqrt %87 : vector<1x128xf32>
    %89 = arith.mulf %85, %88 : vector<1x128xf32>
    %c0_45 = arith.constant 0 : index
    %c0_46 = arith.constant 0 : index
    %90 = vector.load %arg12[%c0_45, %c0_46] : memref<1x128xf32, #tpu.memory_space<vmem>>, vector<1x128xf32>
    %91 = arith.mulf %78, %89 : vector<1x128xf32>
    %92 = arith.subf %90, %91 : vector<1x128xf32>
    %93 = vector.broadcast %89 : vector<1x128xf32> to vector<16x128xf32>
    %94 = arith.mulf %71, %93 : vector<16x128xf32>
    %95 = vector.broadcast %92 : vector<1x128xf32> to vector<16x128xf32>
    %96 = arith.addf %94, %95 : vector<16x128xf32>
    %c0_47 = arith.constant 0 : index
    %c0_48 = arith.constant 0 : index
    %97 = vector.load %arg13[%c0_47, %c0_48] : memref<16x128xf32, #tpu.memory_space<vmem>>, vector<16x128xf32>
    tpu.vector_store %arg13[%c0_47, %c0_48], %96 {strides = array<i32>} : memref<16x128xf32, #tpu.memory_space<vmem>>, vector<16x128xf32>,
    return
  }
}

</mosaic_0001>

<bundles_post_ra>
// kernel: forward.1
= control target key start
LH: loop header
LB: loop body
LE: loop exit
PB: predicated region body
PF: predicated region fallthrough
CT: control target
= control target key end

     0   :  { %18 = vsyncpa [#allocation3], 0  ;;  %s1010_s0 = inlined_call_operand.vmem [shape: bf16[16,128], index: 0, kind: input, shape index: {}]   ;;  %s1011_s1 = inlined_call_operand.hbm [shape: bf16[128,128], index: 1, kind: input, shape index: {}]   ;;  %s1012_s2 = inlined_call_operand.hbm [shape: bf16[128,128], index: 2, kind: input, shape index: {}]   ;;  %s1013_s3 = inlined_call_operand.vmem [shape: bf16[128,128], index: 3, kind: input, shape index: {}]   ;;  %s1014_s4 = inlined_call_operand.vmem [shape: f32[1,128], index: 4, kind: input, shape index: {}]   ;;  %s1015_s5 = inlined_call_operand.vmem [shape: f32[1,128], index: 5, kind: input, shape index: {}]   ;;  %s1016_s6 = inlined_call_operand.vmem [shape: f32[1,128], index: 6, kind: input, shape index: {}]   ;;  %s1017_s7 = inlined_call_operand.vmem [shape: f32[1,128], index: 7, kind: input, shape index: {}]   ;;  %s1018_s8 = inlined_call_operand.vmem [shape: f32[1,128], index: 8, kind: input, shape index: {}]   ;;  %s1019_s9 = inlined_call_operand.vmem [shape: f32[1,128], index: 9, kind: input, shape index: {}]   ;;  %s1020_s10 = inlined_call_operand.vmem [shape: f32[1,128], index: 10, kind: input, shape index: {}]   ;;  %s1021_s11 = inlined_call_operand.vmem [shape: f32[1,128], index: 11, kind: input, shape index: {}]   ;;  %s1022_s12 = inlined_call_operand.vmem [shape: f32[1,128], index: 12, kind: input, shape index: {}]   ;;  %s1023_s13 = inlined_call_operand.hbm [shape: f32[16,128], index: 13, kind: output, shape index: {}]  }
   0x1   :  { %19 = vsyncpa [#allocation6], 0 }
   0x2   :  { %20 = vsyncpa [#allocation4], 0  ;;  %s803_s25 = smov [#allocation2]   ;;  %s731_s29 = scalar_lea.hbm %s1011_s1, 1024 }
   0x3   :  { %s28_s26 = sshll.u32 %s803_s25, 4  ;;  %p732_p0 = scmp.ne.s32.totalorder %s1011_s1, %s731_s29  ;;  %s29_s26 = int_to_ptr.vmem [resolvable:$true] %s28_s26 }
   0x4   :  { %p735_p1 = scmp.lt.u32.totalorder %s731_s29, %s1011_s1 }
   0x6   :  { %p737_p2 = pnand %p735_p1, %p732_p0 }
   0x8   :  { %740 = shalt.err (!%p737_p2)
}
   0x9   :  { %s741_s17 = scalar_lea.vmem %s29_s26, 1024  ;;  %p746_p4 = scmp.lt.s32.totalorder %s29_s26, %s29_s26 }
   0xa   :  { %p742_p3 = scmp.ne.s32.totalorder %s29_s26, %s741_s17  ;;  %p747_p5 = scmp.lt.s32.totalorder %s741_s17, %s741_s17 }
   0xc   :  { %p748_p6 = por %p747_p5, %p746_p4 }
   0xe   :  { %p749_p7 = pnand %p748_p6, %p742_p3 }
  0x10   :  { %752 = shalt.err (!%p749_p7)
}
  0x11   :  { %s804_s18 = smov 64   ;;  %s805_s19 = smov 4  }
  0x12   :  { %34 = dma.hbm_to_vmem [thread:$0]  %s1011_s1, 1024, %s29_s26, [#allocation3], %s804_s18, %s804_s18, %s805_s19  }
  0x13   :  { %s806_s22 = smov [#allocation5]   ;;  %s753_s27 = scalar_lea.hbm %s1012_s2, 1024 }
  0x14   :  { %s40_s23 = sshll.u32 %s806_s22, 4  ;;  %p754_p8 = scmp.ne.s32.totalorder %s1012_s2, %s753_s27  ;;  %s41_s23 = int_to_ptr.vmem [resolvable:$true] %s40_s23 }
  0x15   :  { %p757_p9 = scmp.lt.u32.totalorder %s753_s27, %s1012_s2 }
  0x17   :  { %p759_p10 = pnand %p757_p9, %p754_p8 }
  0x19   :  { %762 = shalt.err (!%p759_p10)
}
  0x1a   :  { %s763_s15 = scalar_lea.vmem %s41_s23, 1024  ;;  %p768_p12 = scmp.lt.s32.totalorder %s41_s23, %s41_s23 }
  0x1b   :  { %p764_p11 = scmp.ne.s32.totalorder %s41_s23, %s763_s15  ;;  %p769_p13 = scmp.lt.s32.totalorder %s763_s15, %s763_s15 }
  0x1d   :  { %p770_p0 = por %p769_p13, %p768_p12 }
  0x1f   :  { %p771_p1 = pnand %p770_p0, %p764_p11 }
  0x21   :  { %774 = shalt.err (!%p771_p1)
}
  0x22   :  { %46 = dma.hbm_to_vmem [thread:$0]  %s1012_s2, 1024, %s41_s23, [#allocation6], %s804_s18, %s804_s18, %s805_s19  }
  0x23   :  { %797 = dma.done.wait [#allocation3], 1024  }
  0x24   :  { %798 = vsyncadd [#allocation3], 4294966272 }
  0x25   :  { %799 = dma.done.wait [#allocation6], 1024  }
  0x26   :  { %800 = vsyncadd [#allocation6], 4294966272  ;;  %v807_v0 = vmov 0.0   ;;  %vm808_vm0 = vmmov 0   ;;  %v700_v1 = vld [vmem:[#allocation2] sm:$0xff]   ;;  %v701_v2 = vld [vmem:[#allocation2 + $0x8] sm:$0xff]   ;;  %v223_v47 = vlaneseq }
  0x27   :  { %631 = vmatprep.subr.bf16.mxu0 %v807_v0  ;;  %647 = vmatprep.mubr.msk.bf16.mxu0 %vm808_vm0, %v807_v0  ;;  %v702_v3 = vld [vmem:[#allocation2 + $0x10] sm:$0xff]   ;;  %v703_v4 = vld [vmem:[#allocation2 + $0x18] sm:$0xff]   ;;  %v704_v5 = vld [vmem:[#allocation2 + $0x20] sm:$0xff]  }
  0x28   :  { %651 = vmatprep.subr.bf16.mxu1 %v807_v0  ;;  %667 = vmatprep.mubr.msk.bf16.mxu1 %vm808_vm0, %v807_v0  ;;  %v705_v6 = vld [vmem:[#allocation2 + $0x28] sm:$0xff]   ;;  %v706_v7 = vld [vmem:[#allocation2 + $0x30] sm:$0xff]   ;;  %v707_v8 = vld [vmem:[#allocation2 + $0x38] sm:$0xff]   ;;  %v224_v48 = vshrl.u32 %v223_v47, 7 }
  0x29   :  { %632 = vmatpush3.bf16.msra.mxu0 %v700_v1  ;;  %v708_v9 = vld [vmem:[%s1010_s0] sm:$0xff]   ;;  %v710_v11 = vld [vmem:[#allocation5 + $0x8] sm:$0xff]   ;;  %v711_v12 = vld [vmem:[#allocation5 + $0x10] sm:$0xff]  }
  0x2a   :  { %633 = vmatprep.subr.bf16.mxu0 %v807_v0  ;;  %v709_v10 = vld [vmem:[#allocation5] sm:$0xff]   ;;  %v712_v13 = vld [vmem:[#allocation5 + $0x18] sm:$0xff]   ;;  %v714_v15 = vld [vmem:[#allocation5 + $0x28] sm:$0xff]   ;;  %v938_v50 = vsub.s32 0, %v224_v48 }
  0x2b   :  { %652 = vmatpush3.bf16.msra.mxu1 %v709_v10  ;;  %v713_v14 = vld [vmem:[#allocation5 + $0x20] sm:$0xff]   ;;  %v715_v16 = vld [vmem:[#allocation5 + $0x30] sm:$0xff]   ;;  %v716_v17 = vld [vmem:[#allocation5 + $0x38] sm:$0xff]  }
  0x2c   :  { %653 = vmatprep.subr.bf16.mxu1 %v807_v0  ;;  %v576_v18 = vld [vmem:[%s1014_s4] ss:$0 sm:$0xff] }
  0x2d   :  { %634 = vmatpush3.bf16.msra.mxu0 %v701_v2  ;;  %v215_v49 = vld [vmem:[%s1017_s7] sm:$0x1]  ;;  %s809_s7 = smov [#allocation7]  }
  0x2e   :  { %635 = vmatprep.subr.bf16.mxu0 %v807_v0  ;;  %v219_v53 = vld [vmem:[%s1020_s10] sm:$0x1]  ;;  %s563_s21 = sshll.u32 %s809_s7, 4  ;;  %s564_s21 = int_to_ptr.vmem [resolvable:$true] %s563_s21 }
  0x2f   :  { %654 = vmatpush3.bf16.msra.mxu1 %v710_v11  ;;  %v717_v2 = vld [vmem:[%s1013_s3] sm:$0xff]   ;;  %p780_p3 = scmp.lt.s32.totalorder %s564_s21, %s564_s21 }
  0x30   :  { %655 = vmatprep.subr.bf16.mxu1 %v807_v0  ;;  %v586_v10 = vld [vmem:[%s1015_s5] ss:$0 sm:$0xff] }
  0x31   :  { %636 = vmatpush3.bf16.msra.mxu0 %v702_v3  ;;  %v718_v3 = vld [vmem:[%s1013_s3 + $0x8] sm:$0xff]  }
  0x32   :  { %637 = vmatprep.subr.bf16.mxu0 %v807_v0 }
  0x33   :  { %656 = vmatpush3.bf16.msra.mxu1 %v711_v12 }
  0x34   :  { %657 = vmatprep.subr.bf16.mxu1 %v807_v0 }
  0x35   :  { %638 = vmatpush3.bf16.msra.mxu0 %v703_v4  ;;  %v719_v4 = vld [vmem:[%s1013_s3 + $0x10] sm:$0xff]  }
  0x36   :  { %639 = vmatprep.subr.bf16.mxu0 %v807_v0 }
  0x37   :  { %658 = vmatpush3.bf16.msra.mxu1 %v712_v13 }
  0x38   :  { %659 = vmatprep.subr.bf16.mxu1 %v807_v0 }
  0x39   :  { %640 = vmatpush3.bf16.msra.mxu0 %v704_v5  ;;  %v720_v5 = vld [vmem:[%s1013_s3 + $0x18] sm:$0xff]  }
  0x3a   :  { %641 = vmatprep.subr.bf16.mxu0 %v807_v0 }
  0x3b   :  { %660 = vmatpush3.bf16.msra.mxu1 %v713_v14 }
  0x3c   :  { %661 = vmatprep.subr.bf16.mxu1 %v807_v0 }
  0x3d   :  { %642 = vmatpush3.bf16.msra.mxu0 %v705_v6  ;;  %v721_v6 = vld [vmem:[%s1013_s3 + $0x20] sm:$0xff]  }
  0x3e   :  { %643 = vmatprep.subr.bf16.mxu0 %v807_v0 }
  0x3f   :  { %662 = vmatpush3.bf16.msra.mxu1 %v714_v15 }
  0x40   :  { %663 = vmatprep.subr.bf16.mxu1 %v807_v0 }
  0x41   :  { %644 = vmatpush3.bf16.msra.mxu0 %v706_v7  ;;  %v722_v7 = vld [vmem:[%s1013_s3 + $0x28] sm:$0xff]  }
  0x42   :  { %645 = vmatprep.subr.bf16.mxu0 %v807_v0 }
  0x43   :  { %664 = vmatpush3.bf16.msra.mxu1 %v715_v16 }
  0x44   :  { %665 = vmatprep.subr.bf16.mxu1 %v807_v0 }
  0x45   :  { %646 = vmatpush3.bf16.msra.mxu0 %v707_v8  ;;  %v723_v8 = vld [vmem:[%s1013_s3 + $0x30] sm:$0xff]  }
  0x46   :  { %671 = vmatprep.subr.bf16.mxu0 %v807_v0 }
  0x47   :  { %666 = vmatpush3.bf16.msra.mxu1 %v716_v17 }
  0x48   :  { %648 = vmatmul.mubr.bf16.vlgmr.msra.gmra.mrb[0].mxu0 %v708_v9  ;;  %v724_v9 = vld [vmem:[%s1013_s3 + $0x38] sm:$0xff]  }
  0x49   :  { %687 = vmatprep.mubr.msk.bf16.mxu0 %vm808_vm0, %v807_v0  ;;  %672 = vmatpush3.bf16.msra.mxu0 %v717_v2 }
  0x4a   :  { %673 = vmatprep.subr.bf16.mxu0 %v807_v0 }
  0x4d   :  { %674 = vmatpush3.bf16.msra.mxu0 %v718_v3 }
  0x4e   :  { %675 = vmatprep.subr.bf16.mxu0 %v807_v0 }
  0x51   :  { %676 = vmatpush3.bf16.msra.mxu0 %v719_v4 }
  0x52   :  { %677 = vmatprep.subr.bf16.mxu0 %v807_v0 }
  0x55   :  { %678 = vmatpush3.bf16.msra.mxu0 %v720_v5 }
  0x56   :  { %679 = vmatprep.subr.bf16.mxu0 %v807_v0 }
  0x59   :  { %680 = vmatpush3.bf16.msra.mxu0 %v721_v6 }
  0x5a   :  { %681 = vmatprep.subr.bf16.mxu0 %v807_v0 }
  0x5d   :  { %682 = vmatpush3.bf16.msra.mxu0 %v722_v7 }
  0x5e   :  { %683 = vmatprep.subr.bf16.mxu0 %v807_v0 }
  0x61   :  { %684 = vmatpush3.bf16.msra.mxu0 %v723_v8 }
  0x62   :  { %685 = vmatprep.subr.bf16.mxu0 %v807_v0 }
  0x65   :  { %686 = vmatpush3.bf16.msra.mxu0 %v724_v9 }
 0x11b   :  { %v187_v19 = vpop.f32.mrb[0].mxu0 }
 0x11c   :  { %v188_v20 = vadd.f32 %v576_v18, %v187_v19  ;;  %v649_v21 = vpop.f32.mrb[1].mxu0 }
 0x11d   :  { %v190_v22 = vpop.f32.mrb[2].mxu0 }
 0x11e   :  { %v191_v23 = vadd.f32 %v576_v18, %v190_v22  ;;  %v650_v24 = vpop.f32.mrb[3].mxu0  ;;  %v201_v25 = vmul.f32 %v188_v20, %v188_v20 }
 0x120   :  { %v194_v26 = vadd.f32 %v191_v23, %v188_v20  ;;  %v202_v27 = vmul.f32 %v191_v23, %v191_v23 }
 0x122   :  { %v195_v28 = vrot.slane %v194_v26, 4  ;;  %v203_v29 = vadd.f32 %v202_v27, %v201_v25 }
 0x124   :  { %v196_v30 = vadd.f32 %v195_v28, %v194_v26  ;;  %v204_v31 = vrot.slane %v203_v29, 4 }
 0x126   :  { %v197_v32 = vrot.slane %v196_v30, 2  ;;  %v205_v33 = vadd.f32 %v204_v31, %v203_v29 }
 0x128   :  { %v198_v34 = vadd.f32 %v197_v32, %v196_v30  ;;  %v206_v35 = vrot.slane %v205_v33, 2 }
 0x12a   :  { %v199_v36 = vrot.slane %v198_v34, 1  ;;  %v207_v37 = vadd.f32 %v206_v35, %v205_v33 }
 0x12c   :  { %v200_v38 = vadd.f32 %v199_v36, %v198_v34  ;;  %v208_v39 = vrot.slane %v207_v37, 1 }
 0x12e   :  { %v209_v40 = vadd.f32 %v208_v39, %v207_v37  ;;  %v210_v41 = vmul.f32 0.0625, %v200_v38  ;;  %v374_v38 = vld [vmem:[%s1018_s8] sm:$0x1] }
 0x130   :  { %v211_v42 = vmul.f32 0.0625, %v209_v40  ;;  %v212_v43 = vmul.f32 %v210_v41, %v210_v41 }
 0x132   :  { %v213_v44 = vsub.f32 %v211_v42, %v212_v43 }
 0x134   :  { %v214_v45 = vmax.f32 %v213_v44, 0.0 }
 0x136   :  { %v216_v46 = vadd.f32 1e-05, %v214_v45 }
 0x138   :  { %725 = vrsqrt.f32 %v216_v46 }
 0x142   :  { %v726_v51 = vpop.eup %725 }
 0x143   :  { %v218_v52 = vmul.f32 %v726_v51, %v215_v49 }
 0x145   :  { %v220_v54 = vmul.f32 %v218_v52, %v210_v41  ;;  %v226_v55 = vrot.slane %v218_v52, %v938_v50  ;;  %v378_v41 = vld [vmem:[%s1021_s11] sm:$0x1] }
 0x147   :  { %v229_v56 = vmul.f32 %v226_v55, %v191_v23  ;;  %v221_v57 = vsub.f32 %v219_v53, %v220_v54  ;;  %v228_v58 = vmul.f32 %v226_v55, %v188_v20  ;;  %v595_v54 = vld [vmem:[%s1016_s6] ss:$0 sm:$0xff] }
 0x149   :  { %v234_v59 = vrot.slane %v221_v57, %v938_v50 }
 0x14b   :  { %v236_v60 = vadd.f32 %v234_v59, %v228_v58  ;;  %v237_v61 = vadd.f32 %v234_v59, %v229_v56 }
 0x14d   :  { %v238_v62 = vmax.f32 %v236_v60, 0.0  ;;  %v239_v63 = vmax.f32 %v237_v61, 0.0 }
 0x14f   :  { %v240_v1 = vpack.c.bf16 %v239_v63, %v238_v62 }
 0x151   :  { %668 = vmatmul.mubr.bf16.vlgmr.msra.gmra.mrb[0].mxu1 %v240_v1 }
 0x224   :  { %v346_v11 = vpop.f32.mrb[0].mxu1 }
 0x225   :  { %v347_v12 = vadd.f32 %v586_v10, %v346_v11  ;;  %v669_v13 = vpop.f32.mrb[1].mxu1 }
 0x226   :  { %v349_v14 = vpop.f32.mrb[2].mxu1 }
 0x227   :  { %v350_v15 = vadd.f32 %v586_v10, %v349_v14  ;;  %v670_v16 = vpop.f32.mrb[3].mxu1  ;;  %v360_v17 = vmul.f32 %v347_v12, %v347_v12 }
 0x229   :  { %v353_v18 = vadd.f32 %v350_v15, %v347_v12  ;;  %v361_v19 = vmul.f32 %v350_v15, %v350_v15 }
 0x22b   :  { %v354_v20 = vrot.slane %v353_v18, 4  ;;  %v362_v0 = vadd.f32 %v361_v19, %v360_v17 }
 0x22d   :  { %v355_v21 = vadd.f32 %v354_v20, %v353_v18  ;;  %v363_v22 = vrot.slane %v362_v0, 4  ;;  %v533_v20 = vld [vmem:[%s1019_s9] sm:$0x1]  ;;  %s775_s9 = scalar_lea.vmem %s564_s21, 256 }
 0x22e   :  { %p776_p2 = scmp.ne.s32.totalorder %s564_s21, %s775_s9  ;;  %p781_p4 = scmp.lt.s32.totalorder %s775_s9, %s775_s9 }
 0x22f   :  { %v356_v23 = vrot.slane %v355_v21, 2  ;;  %v364_v24 = vadd.f32 %v363_v22, %v362_v0  ;;  %v537_v22 = vld [vmem:[%s1022_s12] sm:$0x1] }
 0x230   :  { %p782_p5 = por %p781_p4, %p780_p3 }
 0x231   :  { %v357_v25 = vadd.f32 %v356_v23, %v355_v21  ;;  %v365_v26 = vrot.slane %v364_v24, 2 }
 0x232   :  { %p783_p6 = pnand %p782_p5, %p776_p2 }
 0x233   :  { %v358_v27 = vrot.slane %v357_v25, 1  ;;  %v366_v28 = vadd.f32 %v365_v26, %v364_v24 }
 0x235   :  { %v359_v29 = vadd.f32 %v358_v27, %v357_v25  ;;  %v367_v30 = vrot.slane %v366_v28, 1 }
 0x237   :  { %v368_v31 = vadd.f32 %v367_v30, %v366_v28  ;;  %v369_v32 = vmul.f32 0.0625, %v359_v29 }
 0x239   :  { %v370_v33 = vmul.f32 0.0625, %v368_v31  ;;  %v371_v34 = vmul.f32 %v369_v32, %v369_v32 }
 0x23b   :  { %v372_v35 = vsub.f32 %v370_v33, %v371_v34 }
 0x23d   :  { %v373_v36 = vmax.f32 %v372_v35, 0.0 }
 0x23f   :  { %v375_v37 = vadd.f32 1e-05, %v373_v36 }
 0x241   :  { %727 = vrsqrt.f32 %v375_v37 }
 0x24b   :  { %v728_v39 = vpop.eup %727 }
 0x24c   :  { %v377_v40 = vmul.f32 %v728_v39, %v374_v38 }
 0x24e   :  { %v379_v42 = vmul.f32 %v377_v40, %v369_v32  ;;  %v385_v43 = vrot.slane %v377_v40, %v938_v50 }
 0x250   :  { %v380_v44 = vsub.f32 %v378_v41, %v379_v42  ;;  %v387_v45 = vmul.f32 %v385_v43, %v347_v12  ;;  %v388_v46 = vmul.f32 %v385_v43, %v350_v15 }
 0x252   :  { %v393_v47 = vrot.slane %v380_v44, %v938_v50 }
 0x254   :  { %v396_v48 = vadd.f32 %v393_v47, %v388_v46  ;;  %v395_v49 = vadd.f32 %v393_v47, %v387_v45 }
 0x256   :  { %v398_v51 = vmax.f32 %v396_v48, 0.0  ;;  %v397_v52 = vmax.f32 %v395_v49, 0.0 }
 0x258   :  { %v399_v53 = vpack.c.bf16 %v398_v51, %v397_v52 }
 0x25a   :  { %688 = vmatmul.mubr.bf16.vlgmr.msra.gmra.mrb[4].mxu0 %v399_v53 }
 0x32d   :  { %v505_v55 = vpop.f32.mrb[4].mxu0 }
 0x32e   :  { %v506_v56 = vadd.f32 %v595_v54, %v505_v55  ;;  %v689_v57 = vpop.f32.mrb[5].mxu0 }
 0x32f   :  { %v508_v58 = vpop.f32.mrb[6].mxu0 }
 0x330   :  { %v509_v59 = vadd.f32 %v595_v54, %v508_v58  ;;  %v690_v60 = vpop.f32.mrb[7].mxu0  ;;  %v519_v61 = vmul.f32 %v506_v56, %v506_v56 }
 0x332   :  { %v512_v62 = vadd.f32 %v509_v59, %v506_v56  ;;  %v520_v63 = vmul.f32 %v509_v59, %v509_v59 }
 0x334   :  { %v513_v1 = vrot.slane %v512_v62, 4  ;;  %v521_v2 = vadd.f32 %v520_v63, %v519_v61 }
 0x336   :  { %v514_v3 = vadd.f32 %v513_v1, %v512_v62  ;;  %v522_v4 = vrot.slane %v521_v2, 4 }
 0x338   :  { %v515_v5 = vrot.slane %v514_v3, 2  ;;  %v523_v6 = vadd.f32 %v522_v4, %v521_v2 }
 0x33a   :  { %v516_v7 = vadd.f32 %v515_v5, %v514_v3  ;;  %v524_v8 = vrot.slane %v523_v6, 2 }
 0x33c   :  { %v517_v9 = vrot.slane %v516_v7, 1  ;;  %v525_v10 = vadd.f32 %v524_v8, %v523_v6 }
 0x33e   :  { %v518_v11 = vadd.f32 %v517_v9, %v516_v7  ;;  %v526_v12 = vrot.slane %v525_v10, 1 }
 0x340   :  { %v527_v13 = vadd.f32 %v526_v12, %v525_v10  ;;  %v528_v14 = vmul.f32 0.0625, %v518_v11 }
 0x342   :  { %v529_v15 = vmul.f32 0.0625, %v527_v13  ;;  %v530_v16 = vmul.f32 %v528_v14, %v528_v14 }
 0x344   :  { %v531_v17 = vsub.f32 %v529_v15, %v530_v16 }
 0x346   :  { %v532_v18 = vmax.f32 %v531_v17, 0.0 }
 0x348   :  { %v534_v19 = vadd.f32 1e-05, %v532_v18 }
 0x34a   :  { %729 = vrsqrt.f32 %v534_v19 }
 0x354   :  { %v730_v0 = vpop.eup %729 }
 0x355   :  { %v536_v21 = vmul.f32 %v730_v0, %v533_v20 }
 0x357   :  { %v538_v23 = vmul.f32 %v536_v21, %v528_v14  ;;  %v544_v24 = vrot.slane %v536_v21, %v938_v50 }
 0x359   :  { %v539_v25 = vsub.f32 %v537_v22, %v538_v23  ;;  %v546_v26 = vmul.f32 %v544_v24, %v506_v56  ;;  %v547_v27 = vmul.f32 %v544_v24, %v509_v59 }
 0x35b   :  { %v552_v28 = vrot.slane %v539_v25, %v938_v50 }
 0x35d   :  { %v555_v29 = vadd.f32 %v552_v28, %v547_v27  ;;  %v554_v30 = vadd.f32 %v552_v28, %v546_v26 }
 0x35f   :  { %557 = vst [vmem:[#allocation7 + $0x8] sm:$0xff] %v555_v29  ;;  %556 = vst [vmem:[#allocation7] sm:$0xff] %v554_v30 }
 0x360   :  { %786 = shalt.err (!%p783_p6)
}
 0x361   :  { %s787_s22 = scalar_lea.hbm %s1023_s13, 256 }
 0x362   :  { %p788_p7 = scmp.ne.s32.totalorder %s1023_s13, %s787_s22  ;;  %p791_p8 = scmp.lt.u32.totalorder %s787_s22, %s1023_s13 }
 0x364   :  { %p793_p9 = pnand %p791_p8, %p788_p7 }
 0x366   :  { %796 = shalt.err (!%p793_p9)
}
 0x367   :  { %s810_s28 = smov 128   ;;  %s811_s29 = smov 8  }
 0x368   :  { %569 = dma.vmem_to_hbm [thread:$0]  %s564_s21, 256, %s1023_s13, [#allocation4], %s810_s28, %s810_s28, %s811_s29  }
 0x369   :  { %801 = dma.done.wait [#allocation4], 256  }
 0x36a   :  { %802 = vsyncadd [#allocation4], 4294967040 }
 0x36b   :  { %573 = vsyncpa [#allocation3], 1 }
 0x36c   :  { %574 = vsyncpa [#allocation6], 1 }
 0x36d   :  { %575 = vsyncpa [#allocation4], 1 }

</bundles_post_ra>
